<compile_context>
chip_gen: v7x
topology: tpu7x:2x2x1
jax: 0.10.0
libtpu: 0.0.40
codegen_flags: <defaults>
</compile_context>

<pallas_src>
import functools

import numpy as np
import jax
import jax.numpy as jnp
from jax import lax
from jax.experimental import pallas as pl
from jax.experimental.pallas import tpu as pltpu

BN_EPS = 1e-5

# Tap ordering matches the torch conv weight flattened over (kh, kw):
# t = kh*3 + kw,  (dy, dx) = (kh-1, kw-1)
_TAP_OFFSETS = tuple((kh - 1, kw - 1) for kh in range(3) for kw in range(3))


def _tap_masks_np(H, W):
    """(9, 1, H*W) {0,1} masks; mask[t,0,p]==1 iff tap-t's source pixel of p is
    inside the image (zero-padding semantics of the 3x3 conv).  Per-image
    coordinates, so they also kill cross-image leakage if images share lanes."""
    M = H * W
    row = np.arange(M) // W
    col = np.arange(M) % W
    masks = np.ones((9, 1, M), dtype=np.float32)
    for t, (dy, dx) in enumerate(_TAP_OFFSETS):
        m = np.ones(M, dtype=bool)
        if dy == -1:
            m &= row >= 1
        elif dy == 1:
            m &= row <= H - 2
        if dx == -1:
            m &= col >= 1
        elif dx == 1:
            m &= col <= W - 2
        masks[t, 0, :] = m
    return masks


# ---------------------------------------------------------------------------
# Fused bottleneck kernel: (1x1 -> 3x3 -> 1x1) + residual, BN folded, ReLUs.
# Channels-first "transposed GEMM" layout: every conv is (Cout, Cin) @ (Cin, M)
# so the output minor dim is the lane-dense spatial axis.
# ---------------------------------------------------------------------------
def _make_bottle_kernel(Nb, H, W, short_cut):
    M = H * W

    def kernel(x_ref, mask_ref, w1_ref, b1_ref, w2_ref, b2_ref,
               w3_ref, b3_ref, *rest):
        if short_cut:
            wr_ref, br_ref, o_ref = rest
        else:
            (o_ref,) = rest

        cdt = x_ref.dtype                      # compute dtype (f32 or bf16)

        # Hoist weight / bias / mask loads out of the per-image loop.
        w1 = w1_ref[...]
        b1 = b1_ref[...]
        w2 = w2_ref[...]                       # (C2, 9*Cp), BN scale folded
        b2 = b2_ref[...]
        w3 = w3_ref[...]
        b3 = b3_ref[...]
        if short_cut:
            wr = wr_ref[...]
            br = br_ref[...]
        masks = {t: mask_ref[t] for t, (dy, dx) in enumerate(_TAP_OFFSETS)
                 if (dy, dx) != (0, 0)}        # each (1, M), in cdt

        for n in range(Nb):                    # unrolled small batch block
            x = x_ref[n]                       # (Cin, M): channels on sublanes

            # ---- conv1 (1x1) + folded BN + ReLU (f32 epilogue) -------------
            h1 = jnp.dot(w1, x, preferred_element_type=jnp.float32)
            h1 = jnp.maximum(h1 + b1, 0.0)     # (Cp, M) f32
            h1c = h1.astype(cdt)               # single cast before the taps

            # ---- conv2 (3x3, pad=1) as ONE dot over stacked, rolled taps ----
            taps = []
            for t, (dy, dx) in enumerate(_TAP_OFFSETS):
                s = dy * W + dx                # flat source offset
                tap = h1c if s == 0 else pltpu.roll(h1c, (-s) % M, 1)
                if (dy, dx) != (0, 0):
                    tap = tap * masks[t]       # zero out-of-image sources
                taps.append(tap)
            stacked = jnp.concatenate(taps, axis=0)          # (9*Cp, M) cdt
            h2 = jnp.dot(w2, stacked, preferred_element_type=jnp.float32)
            h2 = jnp.maximum(h2 + b2, 0.0)     # (C2, M) f32

            # ---- conv3 (1x1) + folded BN + ReLU ----------------------------
            h3 = jnp.dot(w3, h2.astype(cdt), preferred_element_type=jnp.float32)
            h3 = jnp.maximum(h3 + b3, 0.0)     # (C4, M) f32

            # ---- residual branch (reuses the resident x tile) --------------
            if short_cut:
                res = jnp.dot(wr, x, preferred_element_type=jnp.float32) + br
            else:
                res = x.astype(jnp.float32)

            o_ref[n] = jnp.maximum(h3 + res, 0.0).astype(o_ref.dtype)

    return kernel


def _default_batch_block(N):
    # Amortize per-grid-step overhead but keep >= 2 grid steps for v7x's 2 TCs.
    for nb in (8, 4, 2):
        if N % nb == 0 and N // nb >= 2:
            return nb
    return 1


# ---------------------------------------------------------------------------
# Forward wrapper: one fused pallas_call, grid over batch blocks.
# ---------------------------------------------------------------------------
@functools.partial(jax.jit,
                   static_argnames=("short_cut", "batch_block", "out_dtype"))
def bottle_block_forward(x_nchw, kparams, short_cut=False, batch_block=None,
                         out_dtype=None):
    N, Cin, H, W = x_nchw.shape
    M = H * W
    cdt = jnp.dtype(kparams["w1"].dtype)       # compute dtype set at param prep
    Cp, Cin_w = kparams["w1"].shape
    C2 = kparams["w2f"].shape[0]
    C4 = kparams["w3"].shape[0]
    if Cin != Cin_w:
        raise ValueError(f"input channels {Cin} != conv1 in-channels {Cin_w}")
    if not short_cut and Cin != C4:
        raise ValueError("identity shortcut requires inplanes == outplanes "
                         f"(got {Cin} vs {C4}); use short_cut=True")

    Nb = _default_batch_block(N) if batch_block is None else int(batch_block)
    if N % Nb != 0:
        raise ValueError(f"batch {N} not divisible by batch_block {Nb}")

    odt = jnp.dtype(cdt if out_dtype is None else out_dtype)

    x3 = x_nchw.reshape(N, Cin, M)             # NCHW is already channels-first
    if x3.dtype != cdt:
        x3 = x3.astype(cdt)
    masks = jnp.asarray(_tap_masks_np(H, W), dtype=cdt)   # trace-time constant

    args = [x3, masks, kparams["w1"], kparams["b1"], kparams["w2f"],
            kparams["b2"], kparams["w3"], kparams["b3"]]
    in_specs = [
        pl.BlockSpec((Nb, Cin, M), lambda n: (n, 0, 0)),
        pl.BlockSpec((9, 1, M), lambda n: (0, 0, 0)),
        pl.BlockSpec((Cp, Cin), lambda n: (0, 0)),
        pl.BlockSpec((Cp, 1), lambda n: (0, 0)),
        pl.BlockSpec((C2, 9 * Cp), lambda n: (0, 0)),
        pl.BlockSpec((C2, 1), lambda n: (0, 0)),
        pl.BlockSpec((C4, C2), lambda n: (0, 0)),
        pl.BlockSpec((C4, 1), lambda n: (0, 0)),
    ]
    if short_cut:
        args += [kparams["wr"], kparams["br"]]
        in_specs += [pl.BlockSpec((C4, Cin), lambda n: (0, 0)),
                     pl.BlockSpec((C4, 1), lambda n: (0, 0))]

    ic = cdt.itemsize
    io = odt.itemsize
    flops = 2 * N * M * (Cin * Cp + 9 * Cp * C2 + C2 * C4
                         + (Cin * C4 if short_cut else 0))
    const_bytes = sum(int(a.size) * a.dtype.itemsize for a in args[1:])
    bytes_accessed = N * Cin * M * ic + N * C4 * M * io + const_bytes

    # Working-set estimate -> explicit scoped-VMEM budget (with headroom).
    blk_bytes = 2 * (Nb * Cin * M * ic + Nb * C4 * M * io) + 2 * const_bytes
    interm = (Cp * M * 4 + 11 * Cp * M * ic          # h1, h1c, 9 taps, stacked
              + C2 * M * (4 + ic) + 2 * C4 * M * 4)  # h2 (+cast), h3, residual
    vmem_limit = int(min(max(2 * (blk_bytes + interm), 32 << 20), 100 << 20))

    out = pl.pallas_call(
        _make_bottle_kernel(Nb, H, W, short_cut),
        out_shape=jax.ShapeDtypeStruct((N, C4, M), odt),
        grid=(N // Nb,),
        in_specs=in_specs,
        out_specs=pl.BlockSpec((Nb, C4, M), lambda n: (n, 0, 0)),
        compiler_params=pltpu.CompilerParams(
            dimension_semantics=("parallel",),
            vmem_limit_bytes=vmem_limit),
        cost_estimate=pl.CostEstimate(flops=flops, transcendentals=0,
                                      bytes_accessed=bytes_accessed),
    )(*args)
    return out.reshape(N, C4, H, W)


# ---------------------------------------------------------------------------
# Parameter construction (torch layout) + one-time kernel-layout folding.
# ---------------------------------------------------------------------------
def _bn_params(key, c):
    k1, k2, k3, k4 = jax.random.split(key, 4)
    gamma = jax.random.uniform(k1, (c,), jnp.float32, 0.5, 1.5)
    beta = jax.random.normal(k2, (c,), jnp.float32) * 0.1
    mean = jax.random.normal(k3, (c,), jnp.float32) * 0.1
    var = jax.random.uniform(k4, (c,), jnp.float32, 0.5, 1.5)
    scale = gamma / jnp.sqrt(var + BN_EPS)
    bias = beta - mean * scale
    return dict(gamma=gamma, beta=beta, mean=mean, var=var, scale=scale, bias=bias)


def init_bottle_block_params(key, inplanes, outplanes):
    """torch-layout params: conv weights (out, in, kh, kw) + BatchNorm stats."""
    planes = outplanes // 4
    ks = jax.random.split(key, 8)
    w1_t = jax.random.normal(ks[0], (planes, inplanes, 1, 1), jnp.float32) * 0.1
    w2_t = jax.random.normal(ks[1], (planes * 2, planes, 3, 3), jnp.float32) * 0.1
    w3_t = jax.random.normal(ks[2], (planes * 4, planes * 2, 1, 1), jnp.float32) * 0.1
    wr_t = jax.random.normal(ks[3], (planes * 4, inplanes, 1, 1), jnp.float32) * 0.1
    return dict(w1_t=w1_t, w2_t=w2_t, w3_t=w3_t, wr_t=wr_t,
                bn1=_bn_params(ks[4], planes),
                bn2=_bn_params(ks[5], planes * 2),
                bn3=_bn_params(ks[6], planes * 4),
                bnr=_bn_params(ks[7], planes * 4))


def fold_params_for_kernel(tp, compute_dtype=jnp.float32):
    """One-time layout plumbing: fold inference-BN scale into conv weights,
    flatten w2 to (C2, 9*Cp) in kernel tap order, cast to the compute dtype."""
    cdt = jnp.dtype(compute_dtype)
    planes = tp["w1_t"].shape[0]
    C2, C4 = planes * 2, planes * 4
    w1 = (tp["w1_t"][:, :, 0, 0] * tp["bn1"]["scale"][:, None]).astype(cdt)
    # (out, in, kh, kw) -> (out, kh, kw, in) -> (C2, 9*Cp); column blocks match
    # the kernel's tap ordering t = kh*3 + kw.
    w2f = (jnp.transpose(tp["w2_t"], (0, 2, 3, 1)).reshape(C2, 9 * planes)
           * tp["bn2"]["scale"][:, None]).astype(cdt)
    w3 = (tp["w3_t"][:, :, 0, 0] * tp["bn3"]["scale"][:, None]).astype(cdt)
    wr = (tp["wr_t"][:, :, 0, 0] * tp["bnr"]["scale"][:, None]).astype(cdt)
    return dict(
        w1=w1, w2f=w2f, w3=w3, wr=wr,
        b1=tp["bn1"]["bias"].reshape(planes, 1),
        b2=tp["bn2"]["bias"].reshape(C2, 1),
        b3=tp["bn3"]["bias"].reshape(C4, 1),
        br=tp["bnr"]["bias"].reshape(C4, 1),
    )


# ---------------------------------------------------------------------------
# Pure-JAX reference (lax.conv, f32) for validation.
# ---------------------------------------------------------------------------
def _bn_ref(y_nhwc, bn):
    return (y_nhwc - bn["mean"]) / jnp.sqrt(bn["var"] + BN_EPS) * bn["gamma"] + bn["beta"]


def _conv_ref(x_nhwc, w_torch, pad):
    w_hwio = jnp.transpose(w_torch, (2, 3, 1, 0))
    return lax.conv_general_dilated(
        x_nhwc, w_hwio, window_strides=(1, 1),
        padding=[(pad, pad), (pad, pad)],
        dimension_numbers=("NHWC", "HWIO", "NHWC"))


def bottle_block_reference(x_nchw, tp, short_cut=False):
    x = jnp.transpose(x_nchw, (0, 2, 3, 1))
    relu = lambda v: jnp.maximum(v, 0.0)
    out = relu(_bn_ref(_conv_ref(x, tp["w1_t"], 0), tp["bn1"]))
    out = relu(_bn_ref(_conv_ref(out, tp["w2_t"], 1), tp["bn2"]))
    out = relu(_bn_ref(_conv_ref(out, tp["w3_t"], 0), tp["bn3"]))
    if short_cut:
        residual = _bn_ref(_conv_ref(x, tp["wr_t"], 0), tp["bnr"])
    else:
        residual = x
    out = relu(out + residual)
    return jnp.transpose(out, (0, 3, 1, 2))


# ---------------------------------------------------------------------------
if __name__ == "__main__":
    key = jax.random.PRNGKey(0)
    kx1, kx2, kp1, kp2 = jax.random.split(key, 4)

    H, W = 16, 16

    # Case 1: identity shortcut (inplanes == outplanes); N=2 -> Nb=1, grid=2.
    N1, inplanes, outplanes = 2, 16, 16
    x1 = jax.random.normal(kx1, (N1, inplanes, H, W), jnp.float32)
    tp1 = init_bottle_block_params(kp1, inplanes, outplanes)
    kparams1 = fold_params_for_kernel(tp1, jnp.float32)
    out1 = jax.block_until_ready(
        bottle_block_forward(x1, kparams1, short_cut=False))
    ref1 = bottle_block_reference(x1, tp1, short_cut=False)
    assert out1.shape == (N1, outplanes, H, W)
    assert jnp.allclose(out1, ref1, atol=1e-4, rtol=1e-4), "identity-shortcut mismatch"

    # Case 2: projection shortcut; N=4 with an explicit batch block (Nb=2, grid=2).
    N2, inplanes2, outplanes2 = 4, 8, 32
    x2 = jax.random.normal(kx2, (N2, inplanes2, H, W), jnp.float32)
    tp2 = init_bottle_block_params(kp2, inplanes2, outplanes2)
    kparams2 = fold_params_for_kernel(tp2, jnp.float32)
    out2 = jax.block_until_ready(
        bottle_block_forward(x2, kparams2, short_cut=True, batch_block=2))
    ref2 = bottle_block_reference(x2, tp2, short_cut=True)
    assert out2.shape == (N2, outplanes2, H, W)
    assert jnp.allclose(out2, ref2, atol=1e-4, rtol=1e-4), "projection-shortcut mismatch"

    # Case 3: bf16 compute + bf16 output (f32 MXU accumulation; valid on
    # v5e/v6e/v7x).  bf16-quantized BN-folded weights -> loose tolerance.
    kparams_bf = fold_params_for_kernel(tp1, jnp.bfloat16)
    out_bf = jax.block_until_ready(
        bottle_block_forward(x1, kparams_bf, short_cut=False))
    assert out_bf.dtype == jnp.bfloat16
    assert jnp.allclose(out_bf.astype(jnp.float32), ref1, atol=1e-1, rtol=1e-1), \
        "bf16 path mismatch"

    print("KERNEL_OK")
</pallas_src>

<mosaic_0001>
module attributes {stable_mosaic.version = 11 : i64} {
  func.func @kernel(%arg0: i32, %arg1: memref<1x16x256xf32, #tpu.memory_space<vmem>>, %arg2: memref<9x1x256xf32, #tpu.memory_space<vmem>>, %arg3: memref<4x16xf32, #tpu.memory_space<vmem>>, %arg4: memref<4x1xf32, #tpu.memory_space<vmem>>, %arg5: memref<8x36xf32, #tpu.memory_space<vmem>>, %arg6: memref<8x1xf32, #tpu.memory_space<vmem>>, %arg7: memref<16x8xf32, #tpu.memory_space<vmem>>, %arg8: memref<16x1xf32, #tpu.memory_space<vmem>>, %arg9: memref<1x16x256xf32, #tpu.memory_space<vmem>>) attributes {dimension_semantics = [#tpu.dimension_semantics<parallel>], iteration_bounds = array<i64: 2>, scalar_prefetch = 0 : i64, scratch_operands = 0 : i64, tpu.core_type = #tpu.core_type<tc>, window_params = [{transform_indices = @transform_0, window_bounds = array<i64: 1, 16, 256>}, {pipeline_mode = #tpu.pipeline_mode<synchronous>, transform_indices = @transform_1, window_bounds = array<i64: 9, 1, 256>}, {pipeline_mode = #tpu.pipeline_mode<synchronous>, transform_indices = @transform_2, window_bounds = array<i64: 4, 16>}, {pipeline_mode = #tpu.pipeline_mode<synchronous>, transform_indices = @transform_3, window_bounds = array<i64: 4, 1>}, {pipeline_mode = #tpu.pipeline_mode<synchronous>, transform_indices = @transform_4, window_bounds = array<i64: 8, 36>}, {pipeline_mode = #tpu.pipeline_mode<synchronous>, transform_indices = @transform_5, window_bounds = array<i64: 8, 1>}, {pipeline_mode = #tpu.pipeline_mode<synchronous>, transform_indices = @transform_6, window_bounds = array<i64: 16, 8>}, {pipeline_mode = #tpu.pipeline_mode<synchronous>, transform_indices = @transform_7, window_bounds = array<i64: 16, 1>}, {transform_indices = @transform_8, window_bounds = array<i64: 1, 16, 256>}]} {
    %c0 = arith.constant 0 : index
    %c0_0 = arith.constant 0 : index
    %0 = vector.load %arg3[%c0, %c0_0] : memref<4x16xf32, #tpu.memory_space<vmem>>, vector<4x16xf32>
    %c0_1 = arith.constant 0 : index
    %c0_2 = arith.constant 0 : index
    %1 = vector.load %arg4[%c0_1, %c0_2] : memref<4x1xf32, #tpu.memory_space<vmem>>, vector<4x1xf32>
    %c0_3 = arith.constant 0 : index
    %c0_4 = arith.constant 0 : index
    %2 = vector.load %arg5[%c0_3, %c0_4] : memref<8x36xf32, #tpu.memory_space<vmem>>, vector<8x36xf32>
    %c0_5 = arith.constant 0 : index
    %c0_6 = arith.constant 0 : index
    %3 = vector.load %arg6[%c0_5, %c0_6] : memref<8x1xf32, #tpu.memory_space<vmem>>, vector<8x1xf32>
    %c0_7 = arith.constant 0 : index
    %c0_8 = arith.constant 0 : index
    %4 = vector.load %arg7[%c0_7, %c0_8] : memref<16x8xf32, #tpu.memory_space<vmem>>, vector<16x8xf32>
    %c0_9 = arith.constant 0 : index
    %c0_10 = arith.constant 0 : index
    %5 = vector.load %arg8[%c0_9, %c0_10] : memref<16x1xf32, #tpu.memory_space<vmem>>, vector<16x1xf32>
    %c0_11 = arith.constant 0 : index
    %c0_12 = arith.constant 0 : index
    %c0_13 = arith.constant 0 : index
    %6 = vector.load %arg2[%c0_11, %c0_12, %c0_13] : memref<9x1x256xf32, #tpu.memory_space<vmem>>, vector<1x1x256xf32>
    %7 = vector.shape_cast %6 : vector<1x1x256xf32> to vector<1x256xf32>
    %c1 = arith.constant 1 : index
    %c0_14 = arith.constant 0 : index
    %c0_15 = arith.constant 0 : index
    %8 = vector.load %arg2[%c1, %c0_14, %c0_15] : memref<9x1x256xf32, #tpu.memory_space<vmem>>, vector<1x1x256xf32>
    %9 = vector.shape_cast %8 : vector<1x1x256xf32> to vector<1x256xf32>
    %c2 = arith.constant 2 : index
    %c0_16 = arith.constant 0 : index
    %c0_17 = arith.constant 0 : index
    %10 = vector.load %arg2[%c2, %c0_16, %c0_17] : memref<9x1x256xf32, #tpu.memory_space<vmem>>, vector<1x1x256xf32>
    %11 = vector.shape_cast %10 : vector<1x1x256xf32> to vector<1x256xf32>
    %c3 = arith.constant 3 : index
    %c0_18 = arith.constant 0 : index
    %c0_19 = arith.constant 0 : index
    %12 = vector.load %arg2[%c3, %c0_18, %c0_19] : memref<9x1x256xf32, #tpu.memory_space<vmem>>, vector<1x1x256xf32>
    %13 = vector.shape_cast %12 : vector<1x1x256xf32> to vector<1x256xf32>
    %c5 = arith.constant 5 : index
    %c0_20 = arith.constant 0 : index
    %c0_21 = arith.constant 0 : index
    %14 = vector.load %arg2[%c5, %c0_20, %c0_21] : memref<9x1x256xf32, #tpu.memory_space<vmem>>, vector<1x1x256xf32>
    %15 = vector.shape_cast %14 : vector<1x1x256xf32> to vector<1x256xf32>
    %c6 = arith.constant 6 : index
    %c0_22 = arith.constant 0 : index
    %c0_23 = arith.constant 0 : index
    %16 = vector.load %arg2[%c6, %c0_22, %c0_23] : memref<9x1x256xf32, #tpu.memory_space<vmem>>, vector<1x1x256xf32>
    %17 = vector.shape_cast %16 : vector<1x1x256xf32> to vector<1x256xf32>
    %c7 = arith.constant 7 : index
    %c0_24 = arith.constant 0 : index
    %c0_25 = arith.constant 0 : index
    %18 = vector.load %arg2[%c7, %c0_24, %c0_25] : memref<9x1x256xf32, #tpu.memory_space<vmem>>, vector<1x1x256xf32>
    %19 = vector.shape_cast %18 : vector<1x1x256xf32> to vector<1x256xf32>
    %c8 = arith.constant 8 : index
    %c0_26 = arith.constant 0 : index
    %c0_27 = arith.constant 0 : index
    %20 = vector.load %arg2[%c8, %c0_26, %c0_27] : memref<9x1x256xf32, #tpu.memory_space<vmem>>, vector<1x1x256xf32>
    %21 = vector.shape_cast %20 : vector<1x1x256xf32> to vector<1x256xf32>
    %c0_28 = arith.constant 0 : index
    %c0_29 = arith.constant 0 : index
    %c0_30 = arith.constant 0 : index
    %22 = vector.load %arg1[%c0_28, %c0_29, %c0_30] : memref<1x16x256xf32, #tpu.memory_space<vmem>>, vector<1x16x256xf32>
    %23 = vector.shape_cast %22 : vector<1x16x256xf32> to vector<16x256xf32>
    %cst = arith.constant dense<0.000000e+00> : vector<4x256xf32>
    %24 = tpu.matmul %0, %23, %cst {dimension_numbers = #tpu.dot_dimension_numbers<[1], [0], [0], [1], [0, 0, 1, 1], [], []>} : vector<4x16xf32>, vector<16x256xf32>, vector<4x256xf32> -> vector<4x256xf32>
    %25 = vector.broadcast %1 : vector<4x1xf32> to vector<4x256xf32>
    %26 = arith.addf %24, %25 : vector<4x256xf32>
    %cst_31 = arith.constant 0.000000e+00 : f32
    %27 = vector.broadcast %cst_31 : f32 to vector<4x256xf32>
    %28 = arith.maximumf %26, %27 : vector<4x256xf32>
    %c17_i32 = arith.constant 17 : i32
    %29 = tpu.dynamic_rotate %28 by %c17_i32 dim 1 : vector<4x256xf32>, i32 -> vector<4x256xf32>
    %30 = vector.broadcast %7 : vector<1x256xf32> to vector<4x256xf32>
    %31 = arith.mulf %29, %30 : vector<4x256xf32>
    %c16_i32 = arith.constant 16 : i32
    %32 = tpu.dynamic_rotate %28 by %c16_i32 dim 1 : vector<4x256xf32>, i32 -> vector<4x256xf32>
    %33 = vector.broadcast %9 : vector<1x256xf32> to vector<4x256xf32>
    %34 = arith.mulf %32, %33 : vector<4x256xf32>
    %c15_i32 = arith.constant 15 : i32
    %35 = tpu.dynamic_rotate %28 by %c15_i32 dim 1 : vector<4x256xf32>, i32 -> vector<4x256xf32>
    %36 = vector.broadcast %11 : vector<1x256xf32> to vector<4x256xf32>
    %37 = arith.mulf %35, %36 : vector<4x256xf32>
    %c1_i32 = arith.constant 1 : i32
    %38 = tpu.dynamic_rotate %28 by %c1_i32 dim 1 : vector<4x256xf32>, i32 -> vector<4x256xf32>
    %39 = vector.broadcast %13 : vector<1x256xf32> to vector<4x256xf32>
    %40 = arith.mulf %38, %39 : vector<4x256xf32>
    %c255_i32 = arith.constant 255 : i32
    %41 = tpu.dynamic_rotate %28 by %c255_i32 dim 1 : vector<4x256xf32>, i32 -> vector<4x256xf32>
    %42 = vector.broadcast %15 : vector<1x256xf32> to vector<4x256xf32>
    %43 = arith.mulf %41, %42 : vector<4x256xf32>
    %c241_i32 = arith.constant 241 : i32
    %44 = tpu.dynamic_rotate %28 by %c241_i32 dim 1 : vector<4x256xf32>, i32 -> vector<4x256xf32>
    %45 = vector.broadcast %17 : vector<1x256xf32> to vector<4x256xf32>
    %46 = arith.mulf %44, %45 : vector<4x256xf32>
    %c240_i32 = arith.constant 240 : i32
    %47 = tpu.dynamic_rotate %28 by %c240_i32 dim 1 : vector<4x256xf32>, i32 -> vector<4x256xf32>
    %48 = vector.broadcast %19 : vector<1x256xf32> to vector<4x256xf32>
    %49 = arith.mulf %47, %48 : vector<4x256xf32>
    %c239_i32 = arith.constant 239 : i32
    %50 = tpu.dynamic_rotate %28 by %c239_i32 dim 1 : vector<4x256xf32>, i32 -> vector<4x256xf32>
    %51 = vector.broadcast %21 : vector<1x256xf32> to vector<4x256xf32>
    %52 = arith.mulf %50, %51 : vector<4x256xf32>
    %53 = tpu.concatenate %31, %34, %37, %40, %28, %43, %46, %49, %52 in 0 : vector<4x256xf32>, vector<4x256xf32>, vector<4x256xf32>, vector<4x256xf32>, vector<4x256xf32>, vector<4x256xf32>, vector<4x256xf32>, vector<4x256xf32>, vector<4x256xf32> -> vector<36x256xf32>
    %cst_32 = arith.constant dense<0.000000e+00> : vector<8x256xf32>
    %54 = tpu.matmul %2, %53, %cst_32 {dimension_numbers = #tpu.dot_dimension_numbers<[1], [0], [0], [1], [0, 0, 1, 1], [], []>} : vector<8x36xf32>, vector<36x256xf32>, vector<8x256xf32> -> vector<8x256xf32>
    %55 = vector.broadcast %3 : vector<8x1xf32> to vector<8x256xf32>
    %56 = arith.addf %54, %55 : vector<8x256xf32>
    %cst_33 = arith.constant 0.000000e+00 : f32
    %57 = vector.broadcast %cst_33 : f32 to vector<8x256xf32>
    %58 = arith.maximumf %56, %57 : vector<8x256xf32>
    %cst_34 = arith.constant dense<0.000000e+00> : vector<16x256xf32>
    %59 = tpu.matmul %4, %58, %cst_34 {dimension_numbers = #tpu.dot_dimension_numbers<[1], [0], [0], [1], [0, 0, 1, 1], [], []>} : vector<16x8xf32>, vector<8x256xf32>, vector<16x256xf32> -> vector<16x256xf32>
    %60 = vector.broadcast %5 : vector<16x1xf32> to vector<16x256xf32>
    %61 = arith.addf %59, %60 : vector<16x256xf32>
    %cst_35 = arith.constant 0.000000e+00 : f32
    %62 = vector.broadcast %cst_35 : f32 to vector<16x256xf32>
    %63 = arith.maximumf %61, %62 : vector<16x256xf32>
    %64 = arith.addf %63, %23 : vector<16x256xf32>
    %cst_36 = arith.constant 0.000000e+00 : f32
    %65 = vector.broadcast %cst_36 : f32 to vector<16x256xf32>
    %66 = arith.maximumf %64, %65 : vector<16x256xf32>
    %c0_37 = arith.constant 0 : index
    %c0_38 = arith.constant 0 : index
    %c0_39 = arith.constant 0 : index
    %67 = vector.load %arg9[%c0_37, %c0_38, %c0_39] : memref<1x16x256xf32, #tpu.memory_space<vmem>>, vector<1x16x256xf32>
    %68 = vector.shape_cast %67 : vector<1x16x256xf32> to vector<16x256xf32>
    %69 = vector.shape_cast %66 : vector<16x256xf32> to vector<1x16x256xf32>
    tpu.vector_store %arg9[%c0_37, %c0_38, %c0_39], %69 {strides = array<i32>} : memref<1x16x256xf32, #tpu.memory_space<vmem>>, vector<1x16x256xf32>,
    return
  }
  func.func @transform_0(%arg0: i32) -> (i32, i32, i32) {
    %c0_i32 = arith.constant 0 : i32
    %c0_i32_0 = arith.constant 0 : i32
    %c0_i32_1 = arith.constant 0 : i32
    return %arg0, %c0_i32, %c0_i32_0 : i32, i32, i32
  }
  func.func @transform_1(%arg0: i32) -> (i32, i32, i32) {
    %c0_i32 = arith.constant 0 : i32
    %c0_i32_0 = arith.constant 0 : i32
    %c0_i32_1 = arith.constant 0 : i32
    %c0_i32_2 = arith.constant 0 : i32
    return %c0_i32, %c0_i32_0, %c0_i32_1 : i32, i32, i32
  }
  func.func @transform_2(%arg0: i32) -> (i32, i32) {
    %c0_i32 = arith.constant 0 : i32
    %c0_i32_0 = arith.constant 0 : i32
    %c0_i32_1 = arith.constant 0 : i32
    return %c0_i32, %c0_i32_0 : i32, i32
  }
  func.func @transform_3(%arg0: i32) -> (i32, i32) {
    %c0_i32 = arith.constant 0 : i32
    %c0_i32_0 = arith.constant 0 : i32
    %c0_i32_1 = arith.constant 0 : i32
    return %c0_i32, %c0_i32_0 : i32, i32
  }
  func.func @transform_4(%arg0: i32) -> (i32, i32) {
    %c0_i32 = arith.constant 0 : i32
    %c0_i32_0 = arith.constant 0 : i32
    %c0_i32_1 = arith.constant 0 : i32
    return %c0_i32, %c0_i32_0 : i32, i32
  }
  func.func @transform_5(%arg0: i32) -> (i32, i32) {
    %c0_i32 = arith.constant 0 : i32
    %c0_i32_0 = arith.constant 0 : i32
    %c0_i32_1 = arith.constant 0 : i32
    return %c0_i32, %c0_i32_0 : i32, i32
  }
  func.func @transform_6(%arg0: i32) -> (i32, i32) {
    %c0_i32 = arith.constant 0 : i32
    %c0_i32_0 = arith.constant 0 : i32
    %c0_i32_1 = arith.constant 0 : i32
    return %c0_i32, %c0_i32_0 : i32, i32
  }
  func.func @transform_7(%arg0: i32) -> (i32, i32) {
    %c0_i32 = arith.constant 0 : i32
    %c0_i32_0 = arith.constant 0 : i32
    %c0_i32_1 = arith.constant 0 : i32
    return %c0_i32, %c0_i32_0 : i32, i32
  }
  func.func @transform_8(%arg0: i32) -> (i32, i32, i32) {
    %c0_i32 = arith.constant 0 : i32
    %c0_i32_0 = arith.constant 0 : i32
    %c0_i32_1 = arith.constant 0 : i32
    return %arg0, %c0_i32, %c0_i32_0 : i32, i32, i32
  }
}

</mosaic_0001>

<bundles_post_ra>
// kernel: bottle_block_forward.1
= control target key start
LH: loop header
LB: loop body
LE: loop exit
PB: predicated region body
PF: predicated region fallthrough
CT: control target
= control target key end

     0   :  { %s984_s27 = smov 0   ;;  %s1162_s0 = inlined_call_operand.vmem [shape: f32[2,16,256], index: 0, kind: input, shape index: {}]   ;;  %s1163_s1 = inlined_call_operand.vmem [shape: f32[9,1,256], index: 1, kind: input, shape index: {}]   ;;  %s1164_s2 = inlined_call_operand.vmem [shape: f32[4,16], index: 2, kind: input, shape index: {}]   ;;  %s1165_s3 = inlined_call_operand.vmem [shape: f32[4,1], index: 3, kind: input, shape index: {}]   ;;  %s1166_s4 = inlined_call_operand.vmem [shape: f32[8,36], index: 4, kind: input, shape index: {}]   ;;  %s1167_s5 = inlined_call_operand.vmem [shape: f32[8,1], index: 5, kind: input, shape index: {}]   ;;  %s1168_s6 = inlined_call_operand.vmem [shape: f32[16,8], index: 6, kind: input, shape index: {}]   ;;  %s1169_s7 = inlined_call_operand.vmem [shape: f32[16,1], index: 7, kind: input, shape index: {}]   ;;  %s1170_s8 = inlined_call_operand.vmem [shape: f32[2,16,256], index: 8, kind: output, shape index: {}]  }
   0x1 LB: > { %s863_s28 = sadd.s32 4294967295, %s927_s27   ;;  %p867_p0 = scmp.ge.s32.totalorder %s927_s27, 1  ;;  %s927_s27 = sphi %s984_s27, %s18_s27  }
   0x2   : > { %p262_p1 = scmp.lt.s32.totalorder %s927_s27, 3 }
   0x4   : > { %p263_p2 = pnand %p867_p0, %p262_p1 }
   0x5   : > { %p296_p3 = scmp.lt.s32.totalorder (!%p263_p2), %s863_s28, 1  ;;  %v929_v0 = vmov (!%p263_p2), 0.0   ;;  %v930_v1 = vmov (!%p263_p2), 0   ;;  %v307_v2 = vld [vmem:[%s1165_s3] sm:$0xf] (!%p263_p2)  ;;  %vm338_vm0 = vcmask (!%p263_p2), 130048   ;;  %v419_v20 = vlaneseq (!%p263_p2) }
   0x6   : > { %266 = sbr.rel (%p263_p2) target bundleno = 835 (0x343), region = 52  ;;  %406 = vmatprep.mubr.f32.mxu0 (!%p263_p2), %v929_v0  ;;  %919 = vset.pattern.permute.xlu0 (!%p263_p2), %v930_v1  ;;  %v306_v9 = vld [vmem:[%s1164_s2] sm:$0xf] (!%p263_p2)  ;;  %s931_s15 = smov (!%p263_p2), 1   ;;  %v313_v19 = vld [vmem:[%s1169_s7 + $0x8] sm:$0xff] (!%p263_p2)  ;;  %vm601_vm6 = vcmask (!%p263_p2), 1043456  }
   0x7   : > { %335 = vperm.xlu0 (!%p263_p2), %919, %v307_v2   ;;  %689 = vmatprep.mubr.f32.mxu1 (!%p263_p2), %v929_v0  ;;  %s932_s16 = smov (!%p263_p2), 16   ;;  %s933_s17 = smov (!%p263_p2), 17   ;;  %v312_v17 = vld [vmem:[%s1169_s7] sm:$0xff] (!%p263_p2)  ;;  %v426_v23 = vshrl.u32 (!%p263_p2), %v419_v20, 7  ;;  %v1050_v26 = vand.u32 (!%p263_p2), 127, %v419_v20  ;;  %vm615_vm10 = vcmask (!%p263_p2), 293888  }
   0x8   : > { %920 = vset.pattern.permute.xlu1 (!%p263_p2), %v930_v1  ;;  %s934_s18 = smov (!%p263_p2), 15   ;;  %s935_s19 = smov (!%p263_p2), 127   ;;  %v309_v18 = vld [vmem:[%s1167_s5] sm:$0xff] (!%p263_p2)  ;;  %v875_v41 = vld [vmem:[%s1163_s1 + $0xa] sm:$0x3] (!%p263_p2)  ;;  %vm708_vm11 = vcmask (!%p263_p2), 64512  }
   0x9   : > { %s936_s20 = smov (!%p263_p2), 112   ;;  %s937_s21 = smov (!%p263_p2), 113   ;;  %v1052_v27 = vsub.s32 (!%p263_p2), 0, %v426_v23  ;;  %v874_v28 = vld [vmem:[%s1163_s1 + $0x6] sm:$0x3] (!%p263_p2)  ;;  %v1057_v29 = vsub.s32 (!%p263_p2), 1, %v426_v23 }
   0xa   : > { %s938_s22 = smov (!%p263_p2), 111   ;;  %v314_v30 = vld [vmem:[%s1163_s1] sm:$0x3] (!%p263_p2)  ;;  %v873_v33 = vld [vmem:[%s1163_s1 + $0x4] sm:$0x3] (!%p263_p2)  ;;  %vm481_vm1 = vcmp.lt.s32.totalorder (!%p263_p2), %v1050_v26, 1 }
   0xb   : > { %v488_v34 = vrot.slane (!%p263_p2), %v874_v28, %v1052_v27  ;;  %v872_v35 = vld [vmem:[%s1163_s1 + $0x2] sm:$0x3] (!%p263_p2)  ;;  %v492_v36 = vrot.slane (!%p263_p2), %v874_v28, %v1057_v29  ;;  %vm421_vm2 = vcmp.lt.s32.totalorder (!%p263_p2), %v1050_v26, 17  ;;  %v428_v37 = vrot.slane (!%p263_p2), %v314_v30, %v1052_v27  ;;  %v877_v42 = vld [vmem:[%s1163_s1 + $0xe] sm:$0x3] (!%p263_p2) }
   0xc   : > { %vm461_vm3 = vcmp.lt.s32.totalorder (!%p263_p2), %v1050_v26, 15  ;;  %v432_v38 = vrot.slane (!%p263_p2), %v314_v30, %v1057_v29  ;;  %v468_v39 = vrot.slane (!%p263_p2), %v873_v33, %v1052_v27  ;;  %v472_v40 = vrot.slane (!%p263_p2), %v873_v33, %v1057_v29  ;;  %v876_v57 = vld [vmem:[%s1163_s1 + $0xc] sm:$0x3] (!%p263_p2) }
   0xd   : > { %s1172_s28 = smov (!%p296_p3, %s863_s28), 1  ;;  %vm441_vm4 = vcmp.lt.s32.totalorder %v1050_v26, 16  ;;  %v448_v47 = vrot.slane %v872_v35, %v1052_v27  ;;  %v452_v48 = vrot.slane %v872_v35, %v1057_v29  ;;  %vm501_vm5 = vcmp.lt.s32.totalorder %v1050_v26, 127 }
   0xe   : > { %s887_s9 = sshll.u32 %s1172_s28, 5  ;;  %v508_v51 = vrot.slane %v875_v41, %v1052_v27  ;;  %v512_v52 = vrot.slane %v875_v41, %v1057_v29  ;;  %vm541_vm7 = vcmp.lt.s32.totalorder %v1050_v26, 112  ;;  %v548_v53 = vrot.slane %v877_v42, %v1052_v27 }
   0xf   : > { %s300_s12 = scalar_lea.vmem %s1162_s0, %s887_s9  ;;  %v552_v56 = vrot.slane %v877_v42, %v1057_v29  ;;  %vm521_vm8 = vcmp.lt.s32.totalorder %v1050_v26, 113  ;;  %vm561_vm9 = vcmp.lt.s32.totalorder %v1050_v26, 111 }
  0x10   : > { %v1005_v3 = vld [vmem:[%s300_s12 + $0x8] sm:$0xff]  ;;  %v1007_v4 = vld [vmem:[%s300_s12 + $0x18] sm:$0xff]  ;;  %v1009_v5 = vld [vmem:[%s300_s12] sm:$0xff] }
  0x11   : > { %v889_v6 = vpack.c.bf16 %v1007_v4, %v1005_v3  ;;  %v1013_v7 = vld [vmem:[%s300_s12 + $0x10] sm:$0xff] }
  0x12   : > { %v891_v8 = vpack.c.bf16 %v1013_v7, %v1009_v5 }
  0x13   : > { %890 = vmatprep.subr.bf16.mxu0 %v889_v6 }
  0x14   : > { %892 = vmatpush1.bf16.msra.mxu0 %v891_v8 }
  0x17   : > { %879 = vmatmul.mubr.msk.f32.vlgmr.msra.gmra.mrb[0].mxu0 %vm338_vm0, %v306_v9 }
  0x18   : > { %779 = vmatprep.mubr.f32.mxu0 %v929_v0 }
  0x86   : > { %v336_v10 = vpop.permute.xlu0 %335 }
  0xea   : > { %v408_v11 = vpop.f32.mrb[0].mxu0 }
  0xeb   : > { %v409_v12 = vadd.f32 %v408_v11, %v336_v10  ;;  %v410_v13 = vpop.f32.mrb[1].mxu0  ;;  %v528_v11 = vrot.slane %v876_v57, %v1052_v27 }
  0xec   : > { %v411_v15 = vadd.f32 %v410_v13, %v336_v10 }
  0xed   : > { %v1021_v14 = vmax.f32 %v409_v12, 0.0  ;;  %v532_v12 = vrot.slane %v876_v57, %v1057_v29 }
  0xee   : > { %v1025_v16 = vmax.f32 %v411_v15, 0.0 }
  0xef   : > { %477 = vrot.lane.b32.xlu1 %v1021_v14, %s931_s15  ;;  %437 = vrot.lane.b32.xlu0 %v1021_v14, %s932_s16 }
  0xf3   : > { %415 = vrot.lane.b32.xlu1 %v1021_v14, %s933_s17  ;;  %479 = vrot.lane.b32.xlu0 %v1025_v16, %s931_s15  ;;  %s305_s15 = scalar_lea.vmem %s1170_s8, %s887_s9 }
  0xf7   : > { %457 = vrot.lane.b32.xlu1 %v1021_v14, %s934_s18  ;;  %417 = vrot.lane.b32.xlu0 %v1025_v16, %s933_s17 }
  0xfb   : > { %497 = vrot.lane.b32.xlu1 %v1021_v14, %s935_s19  ;;  %459 = vrot.lane.b32.xlu0 %v1025_v16, %s934_s18 }
  0xff   : > { %439 = vrot.lane.b32.xlu1 %v1025_v16, %s932_s16  ;;  %499 = vrot.lane.b32.xlu0 %v1025_v16, %s935_s19 }
 0x103   : > { %537 = vrot.lane.b32.xlu1 %v1021_v14, %s936_s20  ;;  %539 = vrot.lane.b32.xlu0 %v1025_v16, %s936_s20 }
 0x107   : > { %517 = vrot.lane.b32.xlu1 %v1021_v14, %s937_s21  ;;  %519 = vrot.lane.b32.xlu0 %v1025_v16, %s937_s21 }
 0x10b   : > { %557 = vrot.lane.b32.xlu1 %v1021_v14, %s938_s22  ;;  %559 = vrot.lane.b32.xlu0 %v1025_v16, %s938_s22 }
 0x10f   : > { %700 = vperm.xlu0 %919, %v312_v17   ;;  %612 = vperm.xlu1 %920, %v309_v18  }
 0x113   : > { %705 = vperm.xlu1 %920, %v313_v19  }
 0x161   : > { %v478_v21 = vpop.permute.xlu1 %477  ;;  %v438_v22 = vpop.permute.xlu0 %437 }
 0x165   : > { %v416_v24 = vpop.permute.xlu1 %415  ;;  %v480_v25 = vpop.permute.xlu0 %479 }
 0x166   : > { %v482_v43 = vsel %vm481_vm1, %v478_v21, %v480_v25  ;;  %v483_v44 = vsel %vm481_vm1, %v480_v25, %v478_v21 }
 0x167   : > { %v495_v54 = vmul.f32 %v488_v34, %v483_v44  ;;  %v496_v55 = vmul.f32 %v492_v36, %v482_v43  ;;  %v878_v36 = vld [vmem:[%s1163_s1 + $0x10] sm:$0x3] }
 0x169   : > { %v458_v31 = vpop.permute.xlu1 %457  ;;  %v418_v32 = vpop.permute.xlu0 %417  ;;  %v585_v13 = vrot.slane %v495_v54, 4  ;;  %v586_v15 = vrot.slane %v496_v55, 4 }
 0x16a   : > { %v422_v58 = vsel %vm421_vm2, %v416_v24, %v418_v32  ;;  %v423_v59 = vsel %vm421_vm2, %v418_v32, %v416_v24 }
 0x16b   : > { %v435_v17 = vmul.f32 %v428_v37, %v423_v59  ;;  %v436_v18 = vmul.f32 %v432_v38, %v422_v58  ;;  %v568_v58 = vrot.slane %v878_v36, %v1052_v27 }
 0x16d   : > { %v498_v45 = vpop.permute.xlu1 %497  ;;  %v460_v46 = vpop.permute.xlu0 %459 }
 0x16e   : > { %v462_v49 = vsel %vm461_vm3, %v458_v31, %v460_v46  ;;  %v463_v50 = vsel %vm461_vm3, %v460_v46, %v458_v31 }
 0x16f   : > { %v475_v60 = vmul.f32 %v468_v39, %v463_v50  ;;  %v476_v61 = vmul.f32 %v472_v40, %v462_v49 }
 0x171   : > { %v440_v62 = vpop.permute.xlu1 %439  ;;  %v500_v63 = vpop.permute.xlu0 %499  ;;  %v605_v30 = vsel %vm601_vm6, %v476_v61, %v586_v15  ;;  %v604_v31 = vsel %vm601_vm6, %v475_v60, %v585_v13 }
 0x172   : > { %v442_v1 = vsel %vm441_vm4, %v438_v22, %v440_v62  ;;  %v443_v2 = vsel %vm441_vm4, %v440_v62, %v438_v22  ;;  %v502_v6 = vsel %vm501_vm5, %v498_v45, %v500_v63  ;;  %v503_v8 = vsel %vm501_vm5, %v500_v63, %v498_v45 }
 0x173   : > { %v455_v9 = vmul.f32 %v448_v47, %v443_v2  ;;  %v456_v10 = vmul.f32 %v452_v48, %v442_v1  ;;  %v515_v21 = vmul.f32 %v508_v51, %v502_v6  ;;  %v516_v22 = vmul.f32 %v512_v52, %v503_v8  ;;  %v310_v6 = vld [vmem:[%s1168_s6] sm:$0xff]  ;;  %v311_v8 = vld [vmem:[%s1168_s6 + $0x8] sm:$0xff] }
 0x174   : > { %v572_v45 = vrot.slane %v878_v36, %v1057_v29 }
 0x175   : > { %v579_v19 = vrot.slane %v455_v9, 4  ;;  %v580_v20 = vrot.slane %v456_v10, 4  ;;  %v538_v23 = vpop.permute.xlu1 %537  ;;  %v540_v24 = vpop.permute.xlu0 %539  ;;  %v591_v39 = vrot.slane %v515_v21, 4  ;;  %v592_v40 = vrot.slane %v516_v22, 4 }
 0x176   : > { %v542_v25 = vsel %vm541_vm7, %v538_v23, %v540_v24  ;;  %v543_v28 = vsel %vm541_vm7, %v540_v24, %v538_v23 }
 0x177   : > { %v555_v32 = vmul.f32 %v548_v53, %v542_v25  ;;  %v556_v33 = vmul.f32 %v552_v56, %v543_v28  ;;  %v603_v34 = vsel %vm601_vm6, %v436_v18, %v580_v20  ;;  %v602_v35 = vsel %vm601_vm6, %v435_v17, %v579_v19 }
 0x178   : > { %v893_v37 = vpack.c.bf16 %v605_v30, %v603_v34  ;;  %v895_v38 = vpack.c.bf16 %v604_v31, %v602_v35  ;;  %v607_v52 = vsel %vm601_vm6, %v1025_v16, %v592_v40  ;;  %v606_v54 = vsel %vm601_vm6, %v1021_v14, %v591_v39  ;;  %v308_v14 = vld [vmem:[%s1166_s4] sm:$0xff] }
 0x179   : > { %v518_v41 = vpop.permute.xlu1 %517  ;;  %v520_v42 = vpop.permute.xlu0 %519  ;;  %v597_v46 = vrot.slane %v555_v32, 4  ;;  %v598_v47 = vrot.slane %v556_v33, 4 }
 0x17a   : > { %v522_v43 = vsel %vm521_vm8, %v518_v41, %v520_v42  ;;  %v523_v44 = vsel %vm521_vm8, %v520_v42, %v518_v41  ;;  %894 = vmatprep.subr.bf16.mxu1 %v893_v37 }
 0x17b   : > { %v535_v48 = vmul.f32 %v528_v11, %v522_v43  ;;  %v536_v49 = vmul.f32 %v532_v12, %v523_v44  ;;  %896 = vmatpush1.bf16.msra.mxu1 %v895_v38 }
 0x17d   : > { %v558_v50 = vpop.permute.xlu1 %557  ;;  %v560_v51 = vpop.permute.xlu0 %559  ;;  %v609_v53 = vsel %vm601_vm6, %v536_v49, %v598_v47  ;;  %v608_v55 = vsel %vm601_vm6, %v535_v48, %v597_v46 }
 0x17e   : > { %v563_v29 = vsel %vm561_vm9, %v560_v51, %v558_v50  ;;  %v897_v56 = vpack.c.bf16 %v609_v53, %v607_v52  ;;  %v899_v57 = vpack.c.bf16 %v608_v55, %v606_v54  ;;  %v562_v60 = vsel %vm561_vm9, %v558_v50, %v560_v51 }
 0x17f   : > { %v576_v59 = vmul.f32 %v572_v45, %v563_v29  ;;  %v575_v16 = vmul.f32 %v568_v58, %v562_v60 }
 0x180   : > { %898 = vmatprep.subr.bf16.mxu1 %v897_v56 }
 0x181   : > { %900 = vmatpush1.bf16.msra.mxu1 %v899_v57 }
 0x182   : > { %880 = vmatprep.subr.msk.mxu1 %vm601_vm6, %v576_v59 }
 0x185   : > { %881 = vmatpush1.msk.msra.mxu1 %vm601_vm6, %v575_v16 }
 0x186   : > { %882 = vmatmul.mubr.msk.f32.vlgmr.msra.gmra.mrb[0].mxu1 %vm615_vm10, %v308_v14 }
 0x18e   : > { %v613_v61 = vpop.permute.xlu1 %612  ;;  %v701_v9 = vpop.permute.xlu0 %700 }
 0x192   : > { %v706_v17 = vpop.permute.xlu1 %705 }
 0x259   : > { %v691_v62 = vpop.f32.mrb[0].mxu1 }
 0x25a   : > { %v692_v27 = vadd.f32 %v691_v62, %v613_v61  ;;  %v693_v63 = vpop.f32.mrb[1].mxu1 }
 0x25b   : > { %v694_v1 = vadd.f32 %v693_v63, %v613_v61 }
 0x25c   : > { %v696_v2 = vmax.f32 %v692_v27, 0.0 }
 0x25d   : > { %v697_v26 = vmax.f32 %v694_v1, 0.0 }
 0x25f   : > { %715 = vmatprep.subr.mxu0 %v697_v26 }
 0x260   : > { %716 = vmatpush1.msra.mxu0 %v696_v2 }
 0x261   : > { %883 = vmatmul.mubr.msk.f32.vlgmr.msra.gmra.mrb[2].mxu0 %vm708_vm11, %v310_v6 }
 0x262   : > { %785 = vmatprep.mubr.f32.mxu0 %v929_v0 }
 0x265   : > { %884 = vmatmul.mubr.msk.f32.gmra.mrb[4].mxu0 %vm708_vm11, %v311_v8 }
 0x334   : > { %v781_v10 = vpop.f32.mrb[2].mxu0 }
 0x335   : > { %v782_v11 = vadd.f32 %v781_v10, %v701_v9  ;;  %v783_v12 = vpop.f32.mrb[3].mxu0 }
 0x336   : > { %v784_v13 = vadd.f32 %v783_v12, %v701_v9 }
 0x337   : > { %v792_v15 = vmax.f32 %v782_v11, 0.0 }
 0x338   : > { %v793_v18 = vmax.f32 %v784_v13, 0.0  ;;  %v787_v19 = vpop.f32.mrb[4].mxu0 }
 0x339   : > { %v796_v20 = vadd.f32 %v792_v15, %v1009_v5  ;;  %v788_v21 = vadd.f32 %v787_v19, %v706_v17  ;;  %v789_v22 = vpop.f32.mrb[5].mxu0 }
 0x33a   : > { %v797_v0 = vadd.f32 %v793_v18, %v1005_v3  ;;  %v790_v23 = vadd.f32 %v789_v22, %v706_v17 }
 0x33b   : > { %v800_v24 = vmax.f32 %v796_v20, 0.0  ;;  %v794_v25 = vmax.f32 %v788_v21, 0.0 }
 0x33c   : > { %v801_v28 = vmax.f32 %v797_v0, 0.0  ;;  %v795_v30 = vmax.f32 %v790_v23, 0.0 }
 0x33d   : > { %804 = vst [vmem:[%s305_s15] sm:$0xff] %v800_v24  ;;  %v798_v31 = vadd.f32 %v794_v25, %v1013_v7 }
 0x33e   : > { %805 = vst [vmem:[%s305_s15 + $0x8] sm:$0xff] %v801_v28  ;;  %v799_v5 = vadd.f32 %v795_v30, %v1007_v4 }
 0x33f   : > { %v802_v32 = vmax.f32 %v798_v31, 0.0 }
 0x340   : > { %v803_v33 = vmax.f32 %v799_v5, 0.0 }
 0x341   : > { %806 = vst [vmem:[%s305_s15 + $0x10] sm:$0xff] %v802_v32 }
 0x342   : > { %807 = vst [vmem:[%s305_s15 + $0x18] sm:$0xff] %v803_v33 }
 0x343 PF: > { %s18_s27 = sadd.s32 1, %s927_s27  }
 0x344   : > { %p15_p4 = scmp.ge.s32.totalorder %s18_s27, 4  }
 0x346   :  { %17 = sbr.rel (!%p15_p4) target bundleno = 1 (0x1), region = 89 }

</bundles_post_ra>
